<compile_context>
chip_gen: v7x
topology: tpu7x:2x2x1
jax: 0.10.0
libtpu: 0.0.40
codegen_flags: <defaults>
</compile_context>

<pallas_src>
import jax
import jax.numpy as jnp
from jax.experimental import pallas as pl
from jax.experimental.pallas import tpu as pltpu
import numpy as np


def qnetwork_kernel(xa_ref, w1_ref, b12_ref, w2_ref, w3_ref, b3_ref, out_ref):
    # fc1 over the (pre-concatenated) [x, a] block; bias + ReLU in f32.
    xa = xa_ref[...]                                    # (TB, d_in) bf16
    b12 = b12_ref[...]                                  # (2, H) f32
    h1 = jnp.dot(xa, w1_ref[...],
                 preferred_element_type=jnp.float32) + b12[0:1, :]
    h1 = jnp.maximum(h1, 0.0)

    # fc2 + ReLU (cast activation back to bf16 only for the MXU operand).
    h2 = jnp.dot(h1.astype(jnp.bfloat16), w2_ref[...],
                 preferred_element_type=jnp.float32) + b12[1:2, :]
    h2 = jnp.maximum(h2, 0.0)

    # fc3: padded 128-lane weight for the MXU, but only the real column (0) is
    # stored -> narrow (TB, 1) output, no write amplification.
    q = jnp.dot(h2.astype(jnp.bfloat16), w3_ref[...],
                preferred_element_type=jnp.float32)
    out_ref[...] = q[:, 0:1] + b3_ref[...]


def _round_up(n, m):
    return ((n + m - 1) // m) * m


def _cdiv(a, b):
    return (a + b - 1) // b


def _choose_block_b(B, max_block=2048):
    """Batch block size: multiple of 128, <= max_block; for larger batches use
    at least 2 blocks so v7x's two TensorCores both get work."""
    Bp = _round_up(B, 128)
    if Bp <= 256:
        return Bp                                   # single small step
    tb = _round_up(_cdiv(Bp, 2), 128)               # >= 2 blocks
    return max(256, min(tb, max_block))


def qnetwork_forward(x, a, kparams, max_block=2048):
    """x: (B, obs_dim) f32, a: (B, act_dim) f32 -> (B, 1) f32."""
    w1, b12, w2, w3p, b3 = kparams
    B = x.shape[0]
    d_in = x.shape[1] + a.shape[1]
    H = w2.shape[0]
    n_pad = w3p.shape[1]

    # Concat once in the wrapper, cast the matmul operand to bf16 (halves the
    # per-batch input DMA bytes; K=16 is a clean sublane multiple).
    xa = jnp.concatenate([x, a], axis=1).astype(jnp.bfloat16)

    # Batch tiling: pad B up to a whole number of TB-row blocks (padded rows
    # carry bias-only garbage and are sliced away below).
    TB = _choose_block_b(B, max_block)
    Bp = _round_up(B, TB)
    if Bp != B:
        xa = jnp.pad(xa, ((0, Bp - B), (0, 0)))
    grid = (Bp // TB,)

    flops = 2 * Bp * (d_in * H + H * H + H * n_pad)
    bytes_accessed = (xa.size * 2 + w1.size * 2 + w2.size * 2 + w3p.size * 2
                      + b12.size * 4 + b3.size * 4 + Bp * 1 * 4)

    out = pl.pallas_call(
        qnetwork_kernel,
        out_shape=jax.ShapeDtypeStruct((Bp, 1), jnp.float32),
        grid=grid,
        in_specs=[
            pl.BlockSpec((TB, d_in),  lambda i: (i, 0)),   # xa: streamed over batch
            pl.BlockSpec((d_in, H),   lambda i: (0, 0)),   # w1: resident
            pl.BlockSpec((2, H),      lambda i: (0, 0)),   # b1/b2 packed: resident
            pl.BlockSpec((H, H),      lambda i: (0, 0)),   # w2: resident
            pl.BlockSpec((H, n_pad),  lambda i: (0, 0)),   # w3 (padded): resident
            pl.BlockSpec((1, 1),      lambda i: (0, 0)),   # b3 scalar: resident
        ],
        out_specs=pl.BlockSpec((TB, 1), lambda i: (i, 0)),  # narrow (TB,1) f32
        compiler_params=pltpu.CompilerParams(
            dimension_semantics=("parallel",)),
        cost_estimate=pl.CostEstimate(flops=flops, transcendentals=0,
                                      bytes_accessed=bytes_accessed),
    )(xa, w1, b12, w2, w3p, b3)

    return out[:B, :]


def init_params(key, obs_dim, act_dim, hidden=256):
    """f32 params mimicking nn.Linear default init (uniform +/- 1/sqrt(fan_in))."""
    in_dim = obs_dim + act_dim
    ks = jax.random.split(key, 6)

    def lin(kw, kb, fan_in, fan_out):
        bound = 1.0 / np.sqrt(fan_in)
        w = jax.random.uniform(kw, (fan_in, fan_out), jnp.float32, -bound, bound)
        b = jax.random.uniform(kb, (1, fan_out), jnp.float32, -bound, bound)
        return w, b

    w1, b1 = lin(ks[0], ks[1], in_dim, hidden)
    w2, b2 = lin(ks[2], ks[3], hidden, hidden)
    w3, b3 = lin(ks[4], ks[5], hidden, 1)
    return (w1, b1, w2, b2, w3, b3)


def pack_params(params_f32, out_pad=128):
    """Kernel-side params: bf16 weights, packed f32 biases, 128-lane-padded
    fc3 weight (MXU operand only; kernel stores just column 0)."""
    w1, b1, w2, b2, w3, b3 = params_f32
    H = w2.shape[0]
    b12 = jnp.concatenate([b1, b2], axis=0)                       # (2, H) f32
    w3p = jnp.zeros((H, out_pad), jnp.float32).at[:, :1].set(w3)  # pad to 128 lanes
    b3s = b3.reshape(1, 1).astype(jnp.float32)                    # (1, 1) f32
    return (w1.astype(jnp.bfloat16), b12, w2.astype(jnp.bfloat16),
            w3p.astype(jnp.bfloat16), b3s)


def reference_forward(x, a, params_f32):
    """Pure-f32 reference matching the PyTorch module."""
    w1, b1, w2, b2, w3, b3 = params_f32
    xa = jnp.concatenate([x, a], axis=1)
    h1 = jax.nn.relu(xa @ w1 + b1)
    h2 = jax.nn.relu(h1 @ w2 + b2)
    return h2 @ w3 + b3


def reference_forward_bf16(x, a, kparams):
    """Reference with the same bf16-operand / f32-accumulate numerics as the kernel."""
    w1, b12, w2, w3p, b3 = kparams
    xa = jnp.concatenate([x, a], axis=1).astype(jnp.bfloat16)
    h1 = jnp.maximum(jnp.dot(xa, w1, preferred_element_type=jnp.float32)
                     + b12[0:1, :], 0.0)
    h2 = jnp.maximum(jnp.dot(h1.astype(jnp.bfloat16), w2,
                             preferred_element_type=jnp.float32) + b12[1:2, :], 0.0)
    q = jnp.dot(h2.astype(jnp.bfloat16), w3p,
                preferred_element_type=jnp.float32)[:, 0:1] + b3
    return q


if __name__ == "__main__":
    key = jax.random.PRNGKey(0)
    k_params, k_x, k_a, k_x2, k_a2 = jax.random.split(key, 5)

    OBS_DIM, ACT_DIM = 12, 4  # small shapes consistent with a flat-obs env
    params_f32 = init_params(k_params, OBS_DIM, ACT_DIM)
    kparams = pack_params(params_f32)

    # --- small batch: single grid step ---
    B = 8
    x = jax.random.normal(k_x, (B, OBS_DIM), jnp.float32)
    a = jax.random.normal(k_a, (B, ACT_DIM), jnp.float32)
    q = jax.block_until_ready(qnetwork_forward(x, a, kparams))
    assert q.shape == (B, 1)

    # exact-numerics check (same bf16/f32-acc math as kernel)
    np.testing.assert_allclose(np.asarray(q),
                               np.asarray(reference_forward_bf16(x, a, kparams)),
                               rtol=1e-3, atol=1e-3)
    # loose check vs the pure-f32 PyTorch-equivalent reference
    np.testing.assert_allclose(np.asarray(q),
                               np.asarray(reference_forward(x, a, params_f32)),
                               rtol=5e-2, atol=5e-2)

    # --- larger, non-multiple batch: exercises multi-block grid + padding path ---
    B2 = 1000
    x2 = jax.random.normal(k_x2, (B2, OBS_DIM), jnp.float32)
    a2 = jax.random.normal(k_a2, (B2, ACT_DIM), jnp.float32)
    q2 = jax.block_until_ready(qnetwork_forward(x2, a2, kparams))
    assert q2.shape == (B2, 1)
    np.testing.assert_allclose(np.asarray(q2),
                               np.asarray(reference_forward(x2, a2, params_f32)),
                               rtol=5e-2, atol=5e-2)

    print("KERNEL_OK")
</pallas_src>

<mosaic_0001>
module attributes {stable_mosaic.version = 11 : i64} {
  func.func @qnetwork_kernel(%arg0: i32, %arg1: memref<128x16xbf16, #tpu.memory_space<vmem>>, %arg2: memref<16x256xbf16, #tpu.memory_space<vmem>>, %arg3: memref<2x256xf32, #tpu.memory_space<vmem>>, %arg4: memref<256x256xbf16, #tpu.memory_space<vmem>>, %arg5: memref<256x128xbf16, #tpu.memory_space<vmem>>, %arg6: memref<1x1xf32, #tpu.memory_space<vmem>>, %arg7: memref<128x1xf32, #tpu.memory_space<vmem>>) attributes {dimension_semantics = [#tpu.dimension_semantics<parallel>], iteration_bounds = array<i64: 1>, scalar_prefetch = 0 : i64, scratch_operands = 0 : i64, tpu.core_type = #tpu.core_type<tc>, window_params = [{transform_indices = @transform_0, window_bounds = array<i64: 128, 16>}, {pipeline_mode = #tpu.pipeline_mode<synchronous>, transform_indices = @transform_1, window_bounds = array<i64: 16, 256>}, {pipeline_mode = #tpu.pipeline_mode<synchronous>, transform_indices = @transform_2, window_bounds = array<i64: 2, 256>}, {pipeline_mode = #tpu.pipeline_mode<synchronous>, transform_indices = @transform_3, window_bounds = array<i64: 256, 256>}, {pipeline_mode = #tpu.pipeline_mode<synchronous>, transform_indices = @transform_4, window_bounds = array<i64: 256, 128>}, {pipeline_mode = #tpu.pipeline_mode<synchronous>, transform_indices = @transform_5, window_bounds = array<i64: 1, 1>}, {transform_indices = @transform_6, window_bounds = array<i64: 128, 1>}]} {
    %c0 = arith.constant 0 : index
    %c0_0 = arith.constant 0 : index
    %0 = vector.load %arg1[%c0, %c0_0] : memref<128x16xbf16, #tpu.memory_space<vmem>>, vector<128x16xbf16>
    %c0_1 = arith.constant 0 : index
    %c0_2 = arith.constant 0 : index
    %1 = vector.load %arg3[%c0_1, %c0_2] : memref<2x256xf32, #tpu.memory_space<vmem>>, vector<2x256xf32>
    %c0_3 = arith.constant 0 : index
    %c0_4 = arith.constant 0 : index
    %2 = vector.load %arg2[%c0_3, %c0_4] : memref<16x256xbf16, #tpu.memory_space<vmem>>, vector<16x256xbf16>
    %cst = arith.constant dense<0.000000e+00> : vector<128x256xf32>
    %3 = tpu.matmul %0, %2, %cst {dimension_numbers = #tpu.dot_dimension_numbers<[1], [0], [0], [1], [0, 0, 1, 1], [], []>} : vector<128x16xbf16>, vector<16x256xbf16>, vector<128x256xf32> -> vector<128x256xf32>
    %4 = vector.extract_strided_slice %1 {offsets = [0, 0], sizes = [1, 256], strides = [1, 1]} : vector<2x256xf32> to vector<1x256xf32>
    %5 = vector.broadcast %4 : vector<1x256xf32> to vector<128x256xf32>
    %6 = arith.addf %3, %5 : vector<128x256xf32>
    %cst_5 = arith.constant 0.000000e+00 : f32
    %7 = vector.broadcast %cst_5 : f32 to vector<128x256xf32>
    %8 = arith.maximumf %6, %7 : vector<128x256xf32>
    %9 = arith.truncf %8 : vector<128x256xf32> to vector<128x256xbf16>
    %c0_6 = arith.constant 0 : index
    %c0_7 = arith.constant 0 : index
    %10 = vector.load %arg4[%c0_6, %c0_7] : memref<256x256xbf16, #tpu.memory_space<vmem>>, vector<256x256xbf16>
    %cst_8 = arith.constant dense<0.000000e+00> : vector<128x256xf32>
    %11 = tpu.matmul %9, %10, %cst_8 {dimension_numbers = #tpu.dot_dimension_numbers<[1], [0], [0], [1], [0, 0, 1, 1], [], []>} : vector<128x256xbf16>, vector<256x256xbf16>, vector<128x256xf32> -> vector<128x256xf32>
    %12 = vector.extract_strided_slice %1 {offsets = [1, 0], sizes = [1, 256], strides = [1, 1]} : vector<2x256xf32> to vector<1x256xf32>
    %13 = vector.broadcast %12 : vector<1x256xf32> to vector<128x256xf32>
    %14 = arith.addf %11, %13 : vector<128x256xf32>
    %cst_9 = arith.constant 0.000000e+00 : f32
    %15 = vector.broadcast %cst_9 : f32 to vector<128x256xf32>
    %16 = arith.maximumf %14, %15 : vector<128x256xf32>
    %17 = arith.truncf %16 : vector<128x256xf32> to vector<128x256xbf16>
    %c0_10 = arith.constant 0 : index
    %c0_11 = arith.constant 0 : index
    %18 = vector.load %arg5[%c0_10, %c0_11] : memref<256x128xbf16, #tpu.memory_space<vmem>>, vector<256x128xbf16>
    %cst_12 = arith.constant dense<0.000000e+00> : vector<128x128xf32>
    %19 = tpu.matmul %17, %18, %cst_12 {dimension_numbers = #tpu.dot_dimension_numbers<[1], [0], [0], [1], [0, 0, 1, 1], [], []>} : vector<128x256xbf16>, vector<256x128xbf16>, vector<128x128xf32> -> vector<128x128xf32>
    %20 = vector.extract_strided_slice %19 {offsets = [0, 0], sizes = [128, 1], strides = [1, 1]} : vector<128x128xf32> to vector<128x1xf32>
    %c0_13 = arith.constant 0 : index
    %c0_14 = arith.constant 0 : index
    %21 = vector.load %arg6[%c0_13, %c0_14] : memref<1x1xf32, #tpu.memory_space<vmem>>, vector<1x1xf32>
    %22 = vector.broadcast %21 : vector<1x1xf32> to vector<128x1xf32>
    %23 = arith.addf %20, %22 : vector<128x1xf32>
    %c0_15 = arith.constant 0 : index
    %c0_16 = arith.constant 0 : index
    %24 = vector.load %arg7[%c0_15, %c0_16] : memref<128x1xf32, #tpu.memory_space<vmem>>, vector<128x1xf32>
    tpu.vector_store %arg7[%c0_15, %c0_16], %23 {strides = array<i32>} : memref<128x1xf32, #tpu.memory_space<vmem>>, vector<128x1xf32>,
    return
  }
  func.func @transform_0(%arg0: i32) -> (i32, i32) {
    %c0_i32 = arith.constant 0 : i32
    %c0_i32_0 = arith.constant 0 : i32
    return %arg0, %c0_i32 : i32, i32
  }
  func.func @transform_1(%arg0: i32) -> (i32, i32) {
    %c0_i32 = arith.constant 0 : i32
    %c0_i32_0 = arith.constant 0 : i32
    %c0_i32_1 = arith.constant 0 : i32
    return %c0_i32, %c0_i32_0 : i32, i32
  }
  func.func @transform_2(%arg0: i32) -> (i32, i32) {
    %c0_i32 = arith.constant 0 : i32
    %c0_i32_0 = arith.constant 0 : i32
    %c0_i32_1 = arith.constant 0 : i32
    return %c0_i32, %c0_i32_0 : i32, i32
  }
  func.func @transform_3(%arg0: i32) -> (i32, i32) {
    %c0_i32 = arith.constant 0 : i32
    %c0_i32_0 = arith.constant 0 : i32
    %c0_i32_1 = arith.constant 0 : i32
    return %c0_i32, %c0_i32_0 : i32, i32
  }
  func.func @transform_4(%arg0: i32) -> (i32, i32) {
    %c0_i32 = arith.constant 0 : i32
    %c0_i32_0 = arith.constant 0 : i32
    %c0_i32_1 = arith.constant 0 : i32
    return %c0_i32, %c0_i32_0 : i32, i32
  }
  func.func @transform_5(%arg0: i32) -> (i32, i32) {
    %c0_i32 = arith.constant 0 : i32
    %c0_i32_0 = arith.constant 0 : i32
    %c0_i32_1 = arith.constant 0 : i32
    return %c0_i32, %c0_i32_0 : i32, i32
  }
  func.func @transform_6(%arg0: i32) -> (i32, i32) {
    %c0_i32 = arith.constant 0 : i32
    %c0_i32_0 = arith.constant 0 : i32
    return %arg0, %c0_i32 : i32, i32
  }
}

</mosaic_0001>

<bundles_post_ra>
// kernel: tpu_custom_call.1
= control target key start
LH: loop header
LB: loop body
LE: loop exit
PB: predicated region body
PF: predicated region fallthrough
CT: control target
= control target key end

     0   :  { %s1515_s0 = inlined_call_operand.vmem [shape: bf16[128,16], index: 0, kind: input, shape index: {}]   ;;  %s1516_s1 = inlined_call_operand.vmem [shape: bf16[16,256], index: 1, kind: input, shape index: {}]   ;;  %s1517_s2 = inlined_call_operand.vmem [shape: f32[2,256], index: 2, kind: input, shape index: {}]   ;;  %s1518_s3 = inlined_call_operand.hbm [shape: bf16[256,256], index: 3, kind: input, shape index: {}]   ;;  %s1519_s4 = inlined_call_operand.hbm [shape: bf16[256,128], index: 4, kind: input, shape index: {}]   ;;  %s1520_s5 = inlined_call_operand.<no memory space> [shape: f32[1,1], index: 5, kind: input, shape index: {}]   ;;  %s1521_s6 = inlined_call_operand.vmem [shape: f32[128,1], index: 6, kind: output, shape index: {}]  }
   0x1   :  { %v11_v0 = vstv %s1520_s5 }
   0x2   :  { %12 = vst [vmem:[#allocation2] sm:$0x1] %v11_v0 }
   0x3   :  { %13 = vsyncpa [#allocation4], 0 }
   0x4   :  { %14 = vsyncpa [#allocation6], 0  ;;  %s1231_s23 = smov [#allocation3]   ;;  %s1183_s27 = scalar_lea.hbm %s1518_s3, 4096 }
   0x5   :  { %s26_s24 = sshll.u32 %s1231_s23, 4  ;;  %p1184_p0 = scmp.ne.s32.totalorder %s1518_s3, %s1183_s27  ;;  %s27_s24 = int_to_ptr.vmem [resolvable:$true] %s26_s24 }
   0x6   :  { %p1187_p1 = scmp.lt.u32.totalorder %s1183_s27, %s1518_s3 }
   0x8   :  { %p1189_p2 = pnand %p1187_p1, %p1184_p0 }
   0xa   :  { %1192 = shalt.err (!%p1189_p2)
}
   0xb   :  { %s1193_s5 = scalar_lea.vmem %s27_s24, 4096  ;;  %p1198_p4 = scmp.lt.s32.totalorder %s27_s24, %s27_s24 }
   0xc   :  { %p1194_p3 = scmp.ne.s32.totalorder %s27_s24, %s1193_s5  ;;  %p1199_p5 = scmp.lt.s32.totalorder %s1193_s5, %s1193_s5 }
   0xe   :  { %p1200_p6 = por %p1199_p5, %p1198_p4 }
  0x10   :  { %p1201_p7 = pnand %p1200_p6, %p1194_p3 }
  0x12   :  { %1204 = shalt.err (!%p1201_p7)
}
  0x13   :  { %s1232_s8 = smov 128   ;;  %s1233_s9 = smov 8  }
  0x14   :  { %32 = dma.hbm_to_vmem [thread:$0]  %s1518_s3, 4096, %s27_s24, [#allocation4], %s1232_s8, %s1232_s8, %s1233_s9  }
  0x15   :  { %s1234_s12 = smov [#allocation5]   ;;  %s1205_s16 = scalar_lea.hbm %s1519_s4, 2048 }
  0x16   :  { %s38_s13 = sshll.u32 %s1234_s12, 4  ;;  %p1206_p8 = scmp.ne.s32.totalorder %s1519_s4, %s1205_s16  ;;  %s39_s13 = int_to_ptr.vmem [resolvable:$true] %s38_s13 }
  0x17   :  { %p1209_p9 = scmp.lt.u32.totalorder %s1205_s16, %s1519_s4 }
  0x19   :  { %p1211_p10 = pnand %p1209_p9, %p1206_p8 }
  0x1b   :  { %1214 = shalt.err (!%p1211_p10)
}
  0x1c   :  { %s1215_s21 = scalar_lea.vmem %s39_s13, 2048  ;;  %p1220_p12 = scmp.lt.s32.totalorder %s39_s13, %s39_s13 }
  0x1d   :  { %p1216_p11 = scmp.ne.s32.totalorder %s39_s13, %s1215_s21  ;;  %p1221_p13 = scmp.lt.s32.totalorder %s1215_s21, %s1215_s21 }
  0x1f   :  { %p1222_p0 = por %p1221_p13, %p1220_p12 }
  0x21   :  { %p1223_p1 = pnand %p1222_p0, %p1216_p11 }
  0x23   :  { %1226 = shalt.err (!%p1223_p1)
}
  0x24   :  { %s1235_s3 = smov 64   ;;  %s1236_s22 = smov 4  }
  0x25   :  { %44 = dma.hbm_to_vmem [thread:$0]  %s1519_s4, 2048, %s39_s13, [#allocation6], %s1235_s3, %s1235_s3, %s1236_s22  }
  0x26   :  { %1227 = dma.done.wait [#allocation4], 4096  }
  0x27   :  { %1228 = vsyncadd [#allocation4], 4294963200 }
  0x28   :  { %1229 = dma.done.wait [#allocation6], 2048  }
  0x29   :  { %1230 = vsyncadd [#allocation6], 4294965248  ;;  %v1237_v1 = vmov 0   ;;  %v1108_v2 = vld [vmem:[%s1516_s1 + $0x4] ss:$8 sps:$4 sm:$0xff]   ;;  %vm142_vm0 = vcmask 130048   ;;  %v74_v58 = vlaneseq }
  0x2a   :  { %199 = vmatprep.mubr.bf16.mxu0 %v1237_v1  ;;  %v1110_v3 = vld [vmem:[%s1516_s1] ss:$8 sps:$4 sm:$0xff]   ;;  %167 = vmatprep.subr.bf16.mxu0 %v1108_v2  ;;  %v1124_v9 = vld [vmem:[#allocation3 + $0x10] ss:$8 sps:$4 sm:$0xff]   ;;  %vm947_vm1 = vcmask 7168  }
  0x2b   :  { %v1111_v4 = vld [vmem:[%s1515_s0] sm:$0xff]   ;;  %168 = vmatpush1.bf16.msra.mxu0 %v1110_v3  ;;  %v1112_v5 = vld [vmem:[%s1515_s0 + $0x8] sm:$0xff]   ;;  %v1113_v12 = vld [vmem:[%s1515_s0 + $0x10] sm:$0xff]   ;;  %v1346_v59 = vshrl.u32 %v74_v58, 7 }
  0x2c   :  { %v1119_v6 = vld [vmem:[#allocation3 + $0x4] ss:$8 sps:$4 sm:$0xff]   ;;  %v1121_v7 = vld [vmem:[#allocation3] ss:$8 sps:$4 sm:$0xff]   ;;  %v1122_v8 = vld [vmem:[#allocation3 + $0x14] ss:$8 sps:$4 sm:$0xff]  }
  0x2d   :  { %538 = vmatprep.subr.bf16.mxu1 %v1119_v6  ;;  %v1125_v10 = vld [vmem:[#allocation3 + $0x24] ss:$8 sps:$4 sm:$0xff]   ;;  %v1127_v11 = vld [vmem:[#allocation3 + $0x20] ss:$8 sps:$4 sm:$0xff]   ;;  %v1128_v13 = vld [vmem:[#allocation3 + $0x34] ss:$8 sps:$4 sm:$0xff]  }
  0x2e   :  { %980 = vmatmul.mubr.msk.bf16.vlgmr.msra.gmra.mrb[0].mxu0 %vm142_vm0, %v1111_v4  ;;  %539 = vmatpush1.bf16.msra.mxu1 %v1121_v7  ;;  %v1130_v14 = vld [vmem:[#allocation3 + $0x30] ss:$8 sps:$4 sm:$0xff]   ;;  %v1131_v15 = vld [vmem:[#allocation3 + $0x44] ss:$8 sps:$4 sm:$0xff]   ;;  %v1133_v16 = vld [vmem:[#allocation3 + $0x40] ss:$8 sps:$4 sm:$0xff]  }
  0x2f   :  { %209 = vmatprep.mubr.bf16.mxu0 %v1237_v1  ;;  %540 = vmatprep.subr.bf16.mxu1 %v1122_v8  ;;  %v1114_v17 = vld [vmem:[%s1515_s0 + $0x18] sm:$0xff]   ;;  %v1137_v20 = vld [vmem:[#allocation3 + $0x64] ss:$8 sps:$4 sm:$0xff]   ;;  %v1139_v21 = vld [vmem:[#allocation3 + $0x60] ss:$8 sps:$4 sm:$0xff]   ;;  %v76_v60 = vsub.s32 0, %v1346_v59 }
  0x30   :  { %v1134_v18 = vld [vmem:[#allocation3 + $0x54] ss:$8 sps:$4 sm:$0xff]   ;;  %v1136_v19 = vld [vmem:[#allocation3 + $0x50] ss:$8 sps:$4 sm:$0xff]   ;;  %v1143_v25 = vld [vmem:[#allocation3 + $0x84] ss:$8 sps:$4 sm:$0xff]  }
  0x31   :  { %v1115_v22 = vld [vmem:[%s1515_s0 + $0x20] sm:$0xff]   ;;  %v1142_v24 = vld [vmem:[#allocation3 + $0x70] ss:$8 sps:$4 sm:$0xff]   ;;  %v1116_v27 = vld [vmem:[%s1515_s0 + $0x28] sm:$0xff]   ;;  %v80_v62 = vsub.s32 2, %v1346_v59 }
  0x32   :  { %541 = vmatpush1.bf16.msra.mxu1 %v1124_v9  ;;  %v1140_v23 = vld [vmem:[#allocation3 + $0x74] ss:$8 sps:$4 sm:$0xff]   ;;  %v1145_v26 = vld [vmem:[#allocation3 + $0x80] ss:$8 sps:$4 sm:$0xff]   ;;  %v1148_v29 = vld [vmem:[#allocation3 + $0x90] ss:$8 sps:$4 sm:$0xff]  }
  0x33   :  { %542 = vmatprep.subr.bf16.mxu1 %v1125_v10  ;;  %v1146_v28 = vld [vmem:[#allocation3 + $0x94] ss:$8 sps:$4 sm:$0xff]   ;;  %v1149_v30 = vld [vmem:[#allocation3 + $0xa4] ss:$8 sps:$4 sm:$0xff]   ;;  %v1151_v31 = vld [vmem:[#allocation3 + $0xa0] ss:$8 sps:$4 sm:$0xff]  }
  0x34   :  { %v1117_v32 = vld [vmem:[%s1515_s0 + $0x30] sm:$0xff]   ;;  %v1157_v36 = vld [vmem:[#allocation3 + $0xc0] ss:$8 sps:$4 sm:$0xff]   ;;  %v1118_v37 = vld [vmem:[%s1515_s0 + $0x38] sm:$0xff]  }
  0x35   :  { %v1152_v33 = vld [vmem:[#allocation3 + $0xb4] ss:$8 sps:$4 sm:$0xff]   ;;  %v1154_v34 = vld [vmem:[#allocation3 + $0xb0] ss:$8 sps:$4 sm:$0xff]   ;;  %v1155_v35 = vld [vmem:[#allocation3 + $0xc4] ss:$8 sps:$4 sm:$0xff]  }
  0x36   :  { %981 = vmatmul.mubr.msk.bf16.gmra.mrb[4].mxu0 %vm142_vm0, %v1112_v5  ;;  %543 = vmatpush1.bf16.msra.mxu1 %v1127_v11  ;;  %v1158_v38 = vld [vmem:[#allocation3 + $0xd4] ss:$8 sps:$4 sm:$0xff]   ;;  %v1160_v39 = vld [vmem:[#allocation3 + $0xd0] ss:$8 sps:$4 sm:$0xff]   ;;  %v1161_v40 = vld [vmem:[#allocation3 + $0xe4] ss:$8 sps:$4 sm:$0xff]  }
  0x37   :  { %219 = vmatprep.mubr.bf16.mxu0 %v1237_v1  ;;  %544 = vmatprep.subr.bf16.mxu1 %v1128_v13  ;;  %v1163_v41 = vld [vmem:[#allocation3 + $0xe0] ss:$8 sps:$4 sm:$0xff]   ;;  %v1164_v42 = vld [vmem:[#allocation3 + $0xf4] ss:$8 sps:$4 sm:$0xff]   ;;  %v1166_v43 = vld [vmem:[#allocation3 + $0xf0] ss:$8 sps:$4 sm:$0xff]  }
  0x38   :  { %v1167_v44 = vld [vmem:[#allocation5 + $0x40] sm:$0xff]   ;;  %v1169_v46 = vld [vmem:[#allocation5 + $0x48] sm:$0xff]   ;;  %v1171_v48 = vld [vmem:[#allocation5 + $0x50] sm:$0xff]  }
  0x39   :  { %v1168_v45 = vld [vmem:[#allocation5] sm:$0xff]   ;;  %1037 = vmatprep.subr.bf16.mxu0 %v1167_v44  ;;  %v1170_v47 = vld [vmem:[#allocation5 + $0x8] sm:$0xff]   ;;  %v1172_v49 = vld [vmem:[#allocation5 + $0x10] sm:$0xff]  }
  0x3a   :  { %545 = vmatpush1.bf16.msra.mxu1 %v1130_v14  ;;  %1038 = vmatpush3.bf16.msra.mxu0 %v1168_v45  ;;  %v1173_v50 = vld [vmem:[#allocation5 + $0x58] sm:$0xff]   ;;  %v1175_v52 = vld [vmem:[#allocation5 + $0x60] sm:$0xff]   ;;  %v1177_v54 = vld [vmem:[#allocation5 + $0x68] sm:$0xff]  }
  0x3b   :  { %546 = vmatprep.subr.bf16.mxu1 %v1131_v15  ;;  %1039 = vmatprep.subr.bf16.mxu0 %v1169_v46  ;;  %v1174_v51 = vld [vmem:[#allocation5 + $0x18] sm:$0xff]   ;;  %v1176_v53 = vld [vmem:[#allocation5 + $0x20] sm:$0xff]   ;;  %v1178_v55 = vld [vmem:[#allocation5 + $0x28] sm:$0xff]  }
  0x3c   :  { %v1179_v56 = vld [vmem:[#allocation5 + $0x70] sm:$0xff]   ;;  %v1352_v61 = vld [vmem:[%s1517_s2] sm:$0xf] }
  0x3d   :  { %v1180_v57 = vld [vmem:[#allocation5 + $0x30] sm:$0xff]   ;;  %v77_v63 = vrot.slane %v1352_v61, %v76_v60  ;;  %v81_v0 = vrot.slane %v1352_v61, %v80_v62 }
  0x3e   :  { %982 = vmatmul.mubr.msk.bf16.gmra.mrb[8].mxu0 %vm142_vm0, %v1113_v12  ;;  %547 = vmatpush1.bf16.msra.mxu1 %v1133_v16 }
  0x3f   :  { %229 = vmatprep.mubr.bf16.mxu0 %v1237_v1  ;;  %548 = vmatprep.subr.bf16.mxu1 %v1134_v18  ;;  %v1359_v2 = vrot.slane %v81_v0, %v76_v60 }
  0x40   :  { %1040 = vmatpush3.bf16.msra.mxu0 %v1170_v47 }
  0x41   :  { %1041 = vmatprep.subr.bf16.mxu0 %v1171_v48 }
  0x42   :  { %549 = vmatpush1.bf16.msra.mxu1 %v1136_v19 }
  0x43   :  { %550 = vmatprep.subr.bf16.mxu1 %v1137_v20 }
  0x44   :  { %1042 = vmatpush3.bf16.msra.mxu0 %v1172_v49 }
  0x45   :  { %1043 = vmatprep.subr.bf16.mxu0 %v1173_v50 }
  0x46   :  { %983 = vmatmul.mubr.msk.bf16.gmra.mrb[12].mxu0 %vm142_vm0, %v1114_v17  ;;  %551 = vmatpush1.bf16.msra.mxu1 %v1139_v21 }
  0x47   :  { %239 = vmatprep.mubr.bf16.mxu0 %v1237_v1  ;;  %552 = vmatprep.subr.bf16.mxu1 %v1140_v23 }
  0x48   :  { %1044 = vmatpush3.bf16.msra.mxu0 %v1174_v51 }
  0x49   :  { %1045 = vmatprep.subr.bf16.mxu0 %v1175_v52 }
  0x4a   :  { %553 = vmatpush1.bf16.msra.mxu1 %v1142_v24 }
  0x4b   :  { %554 = vmatprep.subr.bf16.mxu1 %v1143_v25 }
  0x4c   :  { %1046 = vmatpush3.bf16.msra.mxu0 %v1176_v53 }
  0x4d   :  { %1047 = vmatprep.subr.bf16.mxu0 %v1177_v54 }
  0x4e   :  { %984 = vmatmul.mubr.msk.bf16.gmra.mrb[16].mxu0 %vm142_vm0, %v1115_v22  ;;  %555 = vmatpush1.bf16.msra.mxu1 %v1145_v26 }
  0x4f   :  { %249 = vmatprep.mubr.bf16.mxu0 %v1237_v1  ;;  %556 = vmatprep.subr.bf16.mxu1 %v1146_v28 }
  0x50   :  { %1048 = vmatpush3.bf16.msra.mxu0 %v1178_v55 }
  0x51   :  { %1049 = vmatprep.subr.bf16.mxu0 %v1179_v56 }
  0x52   :  { %557 = vmatpush1.bf16.msra.mxu1 %v1148_v29 }
  0x53   :  { %558 = vmatprep.subr.bf16.mxu1 %v1149_v30 }
  0x54   :  { %1050 = vmatpush3.bf16.msra.mxu0 %v1180_v57 }
  0x56   :  { %985 = vmatmul.mubr.msk.bf16.gmra.mrb[20].mxu0 %vm142_vm0, %v1116_v27  ;;  %559 = vmatpush1.bf16.msra.mxu1 %v1151_v31 }
  0x57   :  { %259 = vmatprep.mubr.bf16.mxu0 %v1237_v1  ;;  %560 = vmatprep.subr.bf16.mxu1 %v1152_v33 }
  0x5a   :  { %561 = vmatpush1.bf16.msra.mxu1 %v1154_v34 }
  0x5b   :  { %562 = vmatprep.subr.bf16.mxu1 %v1155_v35 }
  0x5e   :  { %986 = vmatmul.mubr.msk.bf16.gmra.mrb[24].mxu0 %vm142_vm0, %v1117_v32  ;;  %563 = vmatpush1.bf16.msra.mxu1 %v1157_v36 }
  0x5f   :  { %269 = vmatprep.mubr.bf16.mxu0 %v1237_v1  ;;  %564 = vmatprep.subr.bf16.mxu1 %v1158_v38  ;;  %v1357_v1 = vrot.slane %v77_v63, %v76_v60 }
  0x62   :  { %565 = vmatpush1.bf16.msra.mxu1 %v1160_v39 }
  0x63   :  { %566 = vmatprep.subr.bf16.mxu1 %v1161_v40 }
  0x66   :  { %987 = vmatmul.mubr.msk.bf16.gmra.mrb[28].mxu0 %vm142_vm0, %v1118_v37  ;;  %567 = vmatpush1.bf16.msra.mxu1 %v1163_v41 }
  0x67   :  { %568 = vmatprep.subr.bf16.mxu1 %v1164_v42 }
  0x6a   :  { %569 = vmatpush1.bf16.msra.mxu1 %v1166_v43 }
 0x101   :  { %v201_v3 = vpop.f32.mrb[0].mxu0 }
 0x102   :  { %v202_v4 = vadd.f32 %v201_v3, %v1357_v1  ;;  %v203_v5 = vpop.f32.mrb[1].mxu0 }
 0x103   :  { %v204_v6 = vadd.f32 %v203_v5, %v1359_v2  ;;  %v205_v7 = vpop.f32.mrb[2].mxu0 }
 0x104   :  { %v206_v8 = vadd.f32 %v205_v7, %v1357_v1  ;;  %v207_v9 = vpop.f32.mrb[3].mxu0  ;;  %v280_v11 = vmax.f32 %v202_v4, 0.0 }
 0x105   :  { %v208_v10 = vadd.f32 %v207_v9, %v1359_v2  ;;  %v281_v13 = vmax.f32 %v204_v6, 0.0 }
 0x106   :  { %v282_v12 = vmax.f32 %v206_v8, 0.0 }
 0x107   :  { %v283_v14 = vmax.f32 %v208_v10, 0.0 }
 0x108   :  { %v312_v15 = vpack.c.bf16 %v282_v12, %v280_v11 }
 0x109   :  { %v211_v16 = vpop.f32.mrb[4].mxu0  ;;  %v313_v17 = vpack.c.bf16 %v283_v14, %v281_v13 }
 0x10a   :  { %v212_v18 = vadd.f32 %v211_v16, %v1357_v1  ;;  %v213_v19 = vpop.f32.mrb[5].mxu0 }
 0x10b   :  { %v214_v20 = vadd.f32 %v213_v19, %v1359_v2  ;;  %v215_v21 = vpop.f32.mrb[6].mxu0  ;;  %570 = vmatprep.mubr.bf16.mxu1 %v313_v17 }
 0x10c   :  { %v216_v22 = vadd.f32 %v215_v21, %v1357_v1  ;;  %v217_v23 = vpop.f32.mrb[7].mxu0  ;;  %571 = vmatmul.mubr.bf16.vlgmr.msra.gmra.mrb[0].mxu1 %v312_v15  ;;  %v284_v25 = vmax.f32 %v212_v18, 0.0 }
 0x10d   :  { %v218_v24 = vadd.f32 %v217_v23, %v1359_v2  ;;  %v285_v27 = vmax.f32 %v214_v20, 0.0 }
 0x10e   :  { %v286_v26 = vmax.f32 %v216_v22, 0.0 }
 0x10f   :  { %v287_v28 = vmax.f32 %v218_v24, 0.0 }
 0x110   :  { %v314_v29 = vpack.c.bf16 %v286_v26, %v284_v25 }
 0x111   :  { %v315_v30 = vpack.c.bf16 %v287_v28, %v285_v27  ;;  %v221_v31 = vpop.f32.mrb[8].mxu0 }
 0x112   :  { %v222_v32 = vadd.f32 %v221_v31, %v1357_v1  ;;  %v223_v33 = vpop.f32.mrb[9].mxu0 }
 0x113   :  { %v224_v34 = vadd.f32 %v223_v33, %v1359_v2  ;;  %v225_v35 = vpop.f32.mrb[10].mxu0  ;;  %580 = vmatprep.mubr.bf16.mxu1 %v315_v30 }
 0x114   :  { %v226_v36 = vadd.f32 %v225_v35, %v1357_v1  ;;  %v227_v37 = vpop.f32.mrb[11].mxu0  ;;  %581 = vmatmul.mubr.bf16.gmra.mrb[4].mxu1 %v314_v29  ;;  %v288_v39 = vmax.f32 %v222_v32, 0.0 }
 0x115   :  { %v228_v38 = vadd.f32 %v227_v37, %v1359_v2  ;;  %v289_v41 = vmax.f32 %v224_v34, 0.0 }
 0x116   :  { %v290_v40 = vmax.f32 %v226_v36, 0.0 }
 0x117   :  { %v291_v42 = vmax.f32 %v228_v38, 0.0 }
 0x118   :  { %v316_v43 = vpack.c.bf16 %v290_v40, %v288_v39 }
 0x119   :  { %v317_v44 = vpack.c.bf16 %v291_v42, %v289_v41  ;;  %v231_v45 = vpop.f32.mrb[12].mxu0 }
 0x11a   :  { %v232_v46 = vadd.f32 %v231_v45, %v1357_v1  ;;  %v233_v47 = vpop.f32.mrb[13].mxu0 }
 0x11b   :  { %v234_v48 = vadd.f32 %v233_v47, %v1359_v2  ;;  %v235_v49 = vpop.f32.mrb[14].mxu0  ;;  %590 = vmatprep.mubr.bf16.mxu1 %v317_v44 }
 0x11c   :  { %v236_v50 = vadd.f32 %v235_v49, %v1357_v1  ;;  %v237_v51 = vpop.f32.mrb[15].mxu0  ;;  %591 = vmatmul.mubr.bf16.gmra.mrb[8].mxu1 %v316_v43  ;;  %v292_v53 = vmax.f32 %v232_v46, 0.0 }
 0x11d   :  { %v238_v52 = vadd.f32 %v237_v51, %v1359_v2  ;;  %v293_v55 = vmax.f32 %v234_v48, 0.0 }
 0x11e   :  { %v294_v54 = vmax.f32 %v236_v50, 0.0 }
 0x11f   :  { %v295_v56 = vmax.f32 %v238_v52, 0.0 }
 0x120   :  { %v318_v57 = vpack.c.bf16 %v294_v54, %v292_v53 }
 0x121   :  { %v319_v58 = vpack.c.bf16 %v295_v56, %v293_v55  ;;  %v241_v60 = vpop.f32.mrb[16].mxu0  ;;  %v1181_v55 = vld [vmem:[#allocation5 + $0x78] sm:$0xff]  }
 0x122   :  { %v242_v62 = vadd.f32 %v241_v60, %v1357_v1  ;;  %v243_v63 = vpop.f32.mrb[17].mxu0  ;;  %v1182_v56 = vld [vmem:[#allocation5 + $0x38] sm:$0xff]   ;;  %1051 = vmatprep.subr.bf16.mxu0 %v1181_v55 }
 0x123   :  { %v244_v0 = vadd.f32 %v243_v63, %v1359_v2  ;;  %v245_v3 = vpop.f32.mrb[18].mxu0  ;;  %600 = vmatprep.mubr.bf16.mxu1 %v319_v58  ;;  %1052 = vmatpush3.bf16.msra.mxu0 %v1182_v56 }
 0x124   :  { %v246_v4 = vadd.f32 %v245_v3, %v1357_v1  ;;  %v247_v5 = vpop.f32.mrb[19].mxu0  ;;  %601 = vmatmul.mubr.bf16.gmra.mrb[12].mxu1 %v318_v57  ;;  %v296_v7 = vmax.f32 %v242_v62, 0.0  ;;  %v362_v57 = vsub.s32 1, %v1346_v59 }
 0x125   :  { %v248_v6 = vadd.f32 %v247_v5, %v1359_v2  ;;  %v297_v9 = vmax.f32 %v244_v0, 0.0 }
 0x126   :  { %v298_v8 = vmax.f32 %v246_v4, 0.0  ;;  %v363_v58 = vrot.slane %v1352_v61, %v362_v57 }
 0x127   :  { %v299_v10 = vmax.f32 %v248_v6, 0.0 }
 0x128   :  { %v320_v11 = vpack.c.bf16 %v298_v8, %v296_v7  ;;  %v1397_v60 = vrot.slane %v363_v58, %v362_v57 }
 0x129   :  { %v321_v12 = vpack.c.bf16 %v299_v10, %v297_v9  ;;  %v251_v13 = vpop.f32.mrb[20].mxu0 }
 0x12a   :  { %v252_v14 = vadd.f32 %v251_v13, %v1357_v1  ;;  %v253_v15 = vpop.f32.mrb[21].mxu0 }
 0x12b   :  { %v254_v16 = vadd.f32 %v253_v15, %v1359_v2  ;;  %v255_v17 = vpop.f32.mrb[22].mxu0  ;;  %610 = vmatprep.mubr.bf16.mxu1 %v321_v12 }
 0x12c   :  { %v256_v18 = vadd.f32 %v255_v17, %v1357_v1  ;;  %v257_v19 = vpop.f32.mrb[23].mxu0  ;;  %611 = vmatmul.mubr.bf16.gmra.mrb[16].mxu1 %v320_v11  ;;  %v300_v21 = vmax.f32 %v252_v14, 0.0 }
 0x12d   :  { %v258_v20 = vadd.f32 %v257_v19, %v1359_v2  ;;  %v301_v23 = vmax.f32 %v254_v16, 0.0 }
 0x12e   :  { %v302_v22 = vmax.f32 %v256_v18, 0.0 }
 0x12f   :  { %v303_v24 = vmax.f32 %v258_v20, 0.0 }
 0x130   :  { %v322_v25 = vpack.c.bf16 %v302_v22, %v300_v21 }
 0x131   :  { %v323_v26 = vpack.c.bf16 %v303_v24, %v301_v23  ;;  %v261_v27 = vpop.f32.mrb[24].mxu0 }
 0x132   :  { %v262_v28 = vadd.f32 %v261_v27, %v1357_v1  ;;  %v263_v29 = vpop.f32.mrb[25].mxu0 }
 0x133   :  { %v264_v30 = vadd.f32 %v263_v29, %v1359_v2  ;;  %v265_v31 = vpop.f32.mrb[26].mxu0  ;;  %620 = vmatprep.mubr.bf16.mxu1 %v323_v26 }
 0x134   :  { %v266_v32 = vadd.f32 %v265_v31, %v1357_v1  ;;  %v267_v33 = vpop.f32.mrb[27].mxu0  ;;  %621 = vmatmul.mubr.bf16.gmra.mrb[20].mxu1 %v322_v25  ;;  %v304_v35 = vmax.f32 %v262_v28, 0.0 }
 0x135   :  { %v268_v34 = vadd.f32 %v267_v33, %v1359_v2  ;;  %v305_v37 = vmax.f32 %v264_v30, 0.0 }
 0x136   :  { %v306_v36 = vmax.f32 %v266_v32, 0.0 }
 0x137   :  { %v307_v38 = vmax.f32 %v268_v34, 0.0 }
 0x138   :  { %v324_v39 = vpack.c.bf16 %v306_v36, %v304_v35 }
 0x139   :  { %v325_v40 = vpack.c.bf16 %v307_v38, %v305_v37  ;;  %v271_v41 = vpop.f32.mrb[28].mxu0 }
 0x13a   :  { %v272_v42 = vadd.f32 %v271_v41, %v1357_v1  ;;  %v273_v43 = vpop.f32.mrb[29].mxu0 }
 0x13b   :  { %v274_v44 = vadd.f32 %v273_v43, %v1359_v2  ;;  %v275_v45 = vpop.f32.mrb[30].mxu0  ;;  %630 = vmatprep.mubr.bf16.mxu1 %v325_v40 }
 0x13c   :  { %v276_v46 = vadd.f32 %v275_v45, %v1357_v1  ;;  %v277_v47 = vpop.f32.mrb[31].mxu0  ;;  %631 = vmatmul.mubr.bf16.gmra.mrb[24].mxu1 %v324_v39  ;;  %v308_v49 = vmax.f32 %v272_v42, 0.0  ;;  %v366_v1 = vsub.s32 3, %v1346_v59 }
 0x13d   :  { %v278_v48 = vadd.f32 %v277_v47, %v1359_v2  ;;  %v309_v51 = vmax.f32 %v274_v44, 0.0 }
 0x13e   :  { %v310_v50 = vmax.f32 %v276_v46, 0.0  ;;  %v367_v2 = vrot.slane %v1352_v61, %v366_v1 }
 0x13f   :  { %v311_v52 = vmax.f32 %v278_v48, 0.0 }
 0x140   :  { %v326_v53 = vpack.c.bf16 %v310_v50, %v308_v49  ;;  %v1399_v62 = vrot.slane %v367_v2, %v362_v57 }
 0x141   :  { %v327_v54 = vpack.c.bf16 %v311_v52, %v309_v51 }
 0x143   :  { %640 = vmatprep.mubr.bf16.mxu1 %v327_v54 }
 0x144   :  { %641 = vmatmul.mubr.bf16.gmra.mrb[28].mxu1 %v326_v53 }
 0x1df   :  { %v572_v63 = vpop.f32.mrb[0].mxu1 }
 0x1e0   :  { %v573_v0 = vadd.f32 %v572_v63, %v1397_v60  ;;  %v574_v3 = vpop.f32.mrb[1].mxu1 }
 0x1e1   :  { %v575_v4 = vadd.f32 %v574_v3, %v1399_v62  ;;  %v576_v5 = vpop.f32.mrb[2].mxu1 }
 0x1e2   :  { %v577_v6 = vadd.f32 %v576_v5, %v1397_v60  ;;  %v578_v7 = vpop.f32.mrb[3].mxu1  ;;  %v651_v8 = vmax.f32 %v573_v0, 0.0 }
 0x1e3   :  { %v579_v59 = vadd.f32 %v578_v7, %v1399_v62  ;;  %v652_v10 = vmax.f32 %v575_v4, 0.0 }
 0x1e4   :  { %v653_v9 = vmax.f32 %v577_v6, 0.0 }
 0x1e5   :  { %v654_v61 = vmax.f32 %v579_v59, 0.0 }
 0x1e6   :  { %v683_v11 = vpack.c.bf16 %v653_v9, %v651_v8 }
 0x1e7   :  { %v684_v12 = vpack.c.bf16 %v654_v61, %v652_v10  ;;  %v582_v13 = vpop.f32.mrb[4].mxu1 }
 0x1e8   :  { %v583_v14 = vadd.f32 %v582_v13, %v1397_v60  ;;  %v584_v15 = vpop.f32.mrb[5].mxu1 }
 0x1e9   :  { %v585_v16 = vadd.f32 %v584_v15, %v1399_v62  ;;  %v586_v17 = vpop.f32.mrb[6].mxu1  ;;  %859 = vmatprep.mubr.bf16.mxu0 %v684_v12 }
 0x1ea   :  { %v587_v18 = vadd.f32 %v586_v17, %v1397_v60  ;;  %v588_v19 = vpop.f32.mrb[7].mxu1  ;;  %860 = vmatmul.mubr.bf16.vlgmr.msra.gmra.mrb[32].mxu0 %v683_v11  ;;  %v655_v21 = vmax.f32 %v583_v14, 0.0 }
 0x1eb   :  { %v589_v20 = vadd.f32 %v588_v19, %v1399_v62  ;;  %v656_v23 = vmax.f32 %v585_v16, 0.0 }
 0x1ec   :  { %v657_v22 = vmax.f32 %v587_v18, 0.0 }
 0x1ed   :  { %v658_v24 = vmax.f32 %v589_v20, 0.0 }
 0x1ee   :  { %v685_v25 = vpack.c.bf16 %v657_v22, %v655_v21 }
 0x1ef   :  { %v686_v26 = vpack.c.bf16 %v658_v24, %v656_v23  ;;  %v592_v27 = vpop.f32.mrb[8].mxu1 }
 0x1f0   :  { %v593_v28 = vadd.f32 %v592_v27, %v1397_v60  ;;  %v594_v29 = vpop.f32.mrb[9].mxu1 }
 0x1f1   :  { %v595_v30 = vadd.f32 %v594_v29, %v1399_v62  ;;  %v596_v31 = vpop.f32.mrb[10].mxu1  ;;  %867 = vmatprep.mubr.bf16.mxu0 %v686_v26 }
 0x1f2   :  { %v597_v32 = vadd.f32 %v596_v31, %v1397_v60  ;;  %v598_v33 = vpop.f32.mrb[11].mxu1  ;;  %868 = vmatmul.mubr.bf16.gmra.mrb[36].mxu0 %v685_v25  ;;  %v659_v35 = vmax.f32 %v593_v28, 0.0 }
 0x1f3   :  { %v599_v34 = vadd.f32 %v598_v33, %v1399_v62  ;;  %v660_v37 = vmax.f32 %v595_v30, 0.0 }
 0x1f4   :  { %v661_v36 = vmax.f32 %v597_v32, 0.0 }
 0x1f5   :  { %v662_v38 = vmax.f32 %v599_v34, 0.0 }
 0x1f6   :  { %v687_v39 = vpack.c.bf16 %v661_v36, %v659_v35 }
 0x1f7   :  { %v688_v40 = vpack.c.bf16 %v662_v38, %v660_v37  ;;  %v602_v41 = vpop.f32.mrb[12].mxu1 }
 0x1f8   :  { %v603_v42 = vadd.f32 %v602_v41, %v1397_v60  ;;  %v604_v43 = vpop.f32.mrb[13].mxu1 }
 0x1f9   :  { %v605_v44 = vadd.f32 %v604_v43, %v1399_v62  ;;  %v606_v45 = vpop.f32.mrb[14].mxu1  ;;  %875 = vmatprep.mubr.bf16.mxu0 %v688_v40 }
 0x1fa   :  { %v607_v46 = vadd.f32 %v606_v45, %v1397_v60  ;;  %v608_v47 = vpop.f32.mrb[15].mxu1  ;;  %876 = vmatmul.mubr.bf16.gmra.mrb[40].mxu0 %v687_v39  ;;  %v663_v49 = vmax.f32 %v603_v42, 0.0 }
 0x1fb   :  { %v609_v48 = vadd.f32 %v608_v47, %v1399_v62  ;;  %v664_v51 = vmax.f32 %v605_v44, 0.0 }
 0x1fc   :  { %v665_v50 = vmax.f32 %v607_v46, 0.0 }
 0x1fd   :  { %v666_v52 = vmax.f32 %v609_v48, 0.0 }
 0x1fe   :  { %v689_v53 = vpack.c.bf16 %v665_v50, %v663_v49 }
 0x1ff   :  { %v690_v54 = vpack.c.bf16 %v666_v52, %v664_v51  ;;  %v612_v55 = vpop.f32.mrb[16].mxu1  ;;  %v1433_v51 = vld [vmem:[#allocation2] ss:$0 sm:$0xff] }
 0x200   :  { %v613_v56 = vadd.f32 %v612_v55, %v1397_v60  ;;  %v614_v57 = vpop.f32.mrb[17].mxu1 }
 0x201   :  { %v615_v1 = vadd.f32 %v614_v57, %v1399_v62  ;;  %v616_v58 = vpop.f32.mrb[18].mxu1  ;;  %883 = vmatprep.mubr.bf16.mxu0 %v690_v54 }
 0x202   :  { %v617_v2 = vadd.f32 %v616_v58, %v1397_v60  ;;  %v618_v63 = vpop.f32.mrb[19].mxu1  ;;  %884 = vmatmul.mubr.bf16.gmra.mrb[44].mxu0 %v689_v53  ;;  %v667_v3 = vmax.f32 %v613_v56, 0.0 }
 0x203   :  { %v619_v0 = vadd.f32 %v618_v63, %v1399_v62  ;;  %v668_v5 = vmax.f32 %v615_v1, 0.0 }
 0x204   :  { %v669_v4 = vmax.f32 %v617_v2, 0.0 }
 0x205   :  { %v670_v6 = vmax.f32 %v619_v0, 0.0 }
 0x206   :  { %v691_v7 = vpack.c.bf16 %v669_v4, %v667_v3 }
 0x207   :  { %v692_v59 = vpack.c.bf16 %v670_v6, %v668_v5  ;;  %v622_v8 = vpop.f32.mrb[20].mxu1 }
 0x208   :  { %v623_v9 = vadd.f32 %v622_v8, %v1397_v60  ;;  %v624_v10 = vpop.f32.mrb[21].mxu1 }
 0x209   :  { %v625_v61 = vadd.f32 %v624_v10, %v1399_v62  ;;  %v626_v11 = vpop.f32.mrb[22].mxu1  ;;  %891 = vmatprep.mubr.bf16.mxu0 %v692_v59 }
 0x20a   :  { %v627_v12 = vadd.f32 %v626_v11, %v1397_v60  ;;  %v628_v13 = vpop.f32.mrb[23].mxu1  ;;  %892 = vmatmul.mubr.bf16.gmra.mrb[48].mxu0 %v691_v7  ;;  %v671_v15 = vmax.f32 %v623_v9, 0.0 }
 0x20b   :  { %v629_v14 = vadd.f32 %v628_v13, %v1399_v62  ;;  %v672_v17 = vmax.f32 %v625_v61, 0.0 }
 0x20c   :  { %v673_v16 = vmax.f32 %v627_v12, 0.0 }
 0x20d   :  { %v674_v18 = vmax.f32 %v629_v14, 0.0 }
 0x20e   :  { %v693_v19 = vpack.c.bf16 %v673_v16, %v671_v15 }
 0x20f   :  { %v694_v20 = vpack.c.bf16 %v674_v18, %v672_v17  ;;  %v632_v21 = vpop.f32.mrb[24].mxu1 }
 0x210   :  { %v633_v22 = vadd.f32 %v632_v21, %v1397_v60  ;;  %v634_v23 = vpop.f32.mrb[25].mxu1 }
 0x211   :  { %v635_v24 = vadd.f32 %v634_v23, %v1399_v62  ;;  %v636_v25 = vpop.f32.mrb[26].mxu1  ;;  %899 = vmatprep.mubr.bf16.mxu0 %v694_v20 }
 0x212   :  { %v637_v26 = vadd.f32 %v636_v25, %v1397_v60  ;;  %v638_v27 = vpop.f32.mrb[27].mxu1  ;;  %900 = vmatmul.mubr.bf16.gmra.mrb[52].mxu0 %v693_v19  ;;  %v675_v29 = vmax.f32 %v633_v22, 0.0 }
 0x213   :  { %v639_v28 = vadd.f32 %v638_v27, %v1399_v62  ;;  %v676_v31 = vmax.f32 %v635_v24, 0.0 }
 0x214   :  { %v677_v30 = vmax.f32 %v637_v26, 0.0 }
 0x215   :  { %v678_v32 = vmax.f32 %v639_v28, 0.0 }
 0x216   :  { %v695_v33 = vpack.c.bf16 %v677_v30, %v675_v29 }
 0x217   :  { %v696_v34 = vpack.c.bf16 %v678_v32, %v676_v31  ;;  %v642_v35 = vpop.f32.mrb[28].mxu1 }
 0x218   :  { %v643_v36 = vadd.f32 %v642_v35, %v1397_v60  ;;  %v644_v37 = vpop.f32.mrb[29].mxu1 }
 0x219   :  { %v645_v38 = vadd.f32 %v644_v37, %v1399_v62  ;;  %v646_v39 = vpop.f32.mrb[30].mxu1  ;;  %907 = vmatprep.mubr.bf16.mxu0 %v696_v34 }
 0x21a   :  { %v647_v40 = vadd.f32 %v646_v39, %v1397_v60  ;;  %v648_v41 = vpop.f32.mrb[31].mxu1  ;;  %908 = vmatmul.mubr.bf16.gmra.mrb[56].mxu0 %v695_v33  ;;  %v679_v43 = vmax.f32 %v643_v36, 0.0 }
 0x21b   :  { %v649_v42 = vadd.f32 %v648_v41, %v1399_v62  ;;  %v680_v45 = vmax.f32 %v645_v38, 0.0 }
 0x21c   :  { %v681_v44 = vmax.f32 %v647_v40, 0.0 }
 0x21d   :  { %v682_v46 = vmax.f32 %v649_v42, 0.0 }
 0x21e   :  { %v697_v47 = vpack.c.bf16 %v681_v44, %v679_v43 }
 0x21f   :  { %v698_v48 = vpack.c.bf16 %v682_v46, %v680_v45 }
 0x221   :  { %915 = vmatprep.mubr.bf16.mxu0 %v698_v48 }
 0x222   :  { %916 = vmatmul.mubr.bf16.gmra.mrb[60].mxu0 %v697_v47 }
 0x2bd   :  { %v1053_v49 = vpop.f32.mrb[32].mxu0 }
 0x2be   :  { %v1054_v50 = vpop.f32.mrb[33].mxu0 }
 0x2bf   :  { %v1055_v52 = vadd.f32 %v1054_v50, %v1053_v49  ;;  %v1056_v53 = vpop.f32.mrb[34].mxu0 }
 0x2c0   :  { %v1057_v60 = vpop.f32.mrb[35].mxu0 }
 0x2c1   :  { %v931_v54 = vadd.f32 %v1055_v52, %v1433_v51  ;;  %v1058_v55 = vadd.f32 %v1057_v60, %v1056_v53 }
 0x2c3   :  { %948 = vst.msk [vmem:[%s1521_s6] sm:$0xff] %vm947_vm1, %v931_v54  ;;  %v932_v62 = vadd.f32 %v1058_v55, %v1433_v51 }
 0x2c5   :  { %949 = vst.msk [vmem:[%s1521_s6 + $0x8] sm:$0xff] %vm947_vm1, %v932_v62  ;;  %v1059_v56 = vpop.f32.mrb[36].mxu0 }
 0x2c6   :  { %v1060_v57 = vpop.f32.mrb[37].mxu0 }
 0x2c7   :  { %v1061_v1 = vadd.f32 %v1060_v57, %v1059_v56  ;;  %v1062_v58 = vpop.f32.mrb[38].mxu0 }
 0x2c8   :  { %v1063_v2 = vpop.f32.mrb[39].mxu0 }
 0x2c9   :  { %v933_v63 = vadd.f32 %v1061_v1, %v1433_v51  ;;  %v1064_v0 = vadd.f32 %v1063_v2, %v1062_v58 }
 0x2cb   :  { %950 = vst.msk [vmem:[%s1521_s6 + $0x10] sm:$0xff] %vm947_vm1, %v933_v63  ;;  %v934_v3 = vadd.f32 %v1064_v0, %v1433_v51 }
 0x2cd   :  { %951 = vst.msk [vmem:[%s1521_s6 + $0x18] sm:$0xff] %vm947_vm1, %v934_v3  ;;  %v1065_v4 = vpop.f32.mrb[40].mxu0 }
 0x2ce   :  { %v1066_v5 = vpop.f32.mrb[41].mxu0 }
 0x2cf   :  { %v1067_v6 = vadd.f32 %v1066_v5, %v1065_v4  ;;  %v1068_v7 = vpop.f32.mrb[42].mxu0 }
 0x2d0   :  { %v1069_v59 = vpop.f32.mrb[43].mxu0 }
 0x2d1   :  { %v935_v8 = vadd.f32 %v1067_v6, %v1433_v51  ;;  %v1070_v9 = vadd.f32 %v1069_v59, %v1068_v7 }
 0x2d3   :  { %952 = vst.msk [vmem:[%s1521_s6 + $0x20] sm:$0xff] %vm947_vm1, %v935_v8  ;;  %v936_v10 = vadd.f32 %v1070_v9, %v1433_v51 }
 0x2d5   :  { %953 = vst.msk [vmem:[%s1521_s6 + $0x28] sm:$0xff] %vm947_vm1, %v936_v10  ;;  %v1071_v61 = vpop.f32.mrb[44].mxu0 }
 0x2d6   :  { %v1072_v11 = vpop.f32.mrb[45].mxu0 }
 0x2d7   :  { %v1073_v12 = vadd.f32 %v1072_v11, %v1071_v61  ;;  %v1074_v13 = vpop.f32.mrb[46].mxu0 }
 0x2d8   :  { %v1075_v14 = vpop.f32.mrb[47].mxu0 }
 0x2d9   :  { %v937_v15 = vadd.f32 %v1073_v12, %v1433_v51  ;;  %v1076_v16 = vadd.f32 %v1075_v14, %v1074_v13 }
 0x2db   :  { %954 = vst.msk [vmem:[%s1521_s6 + $0x30] sm:$0xff] %vm947_vm1, %v937_v15  ;;  %v938_v17 = vadd.f32 %v1076_v16, %v1433_v51 }
 0x2dd   :  { %955 = vst.msk [vmem:[%s1521_s6 + $0x38] sm:$0xff] %vm947_vm1, %v938_v17  ;;  %v1077_v18 = vpop.f32.mrb[48].mxu0 }
 0x2de   :  { %v1078_v19 = vpop.f32.mrb[49].mxu0 }
 0x2df   :  { %v1079_v20 = vadd.f32 %v1078_v19, %v1077_v18  ;;  %v1080_v21 = vpop.f32.mrb[50].mxu0 }
 0x2e0   :  { %v1081_v22 = vpop.f32.mrb[51].mxu0 }
 0x2e1   :  { %v939_v23 = vadd.f32 %v1079_v20, %v1433_v51  ;;  %v1082_v24 = vadd.f32 %v1081_v22, %v1080_v21 }
 0x2e3   :  { %956 = vst.msk [vmem:[%s1521_s6 + $0x40] sm:$0xff] %vm947_vm1, %v939_v23  ;;  %v940_v25 = vadd.f32 %v1082_v24, %v1433_v51 }
 0x2e5   :  { %957 = vst.msk [vmem:[%s1521_s6 + $0x48] sm:$0xff] %vm947_vm1, %v940_v25  ;;  %v1083_v26 = vpop.f32.mrb[52].mxu0 }
 0x2e6   :  { %v1084_v27 = vpop.f32.mrb[53].mxu0 }
 0x2e7   :  { %v1085_v28 = vadd.f32 %v1084_v27, %v1083_v26  ;;  %v1086_v29 = vpop.f32.mrb[54].mxu0 }
 0x2e8   :  { %v1087_v30 = vpop.f32.mrb[55].mxu0 }
 0x2e9   :  { %v941_v31 = vadd.f32 %v1085_v28, %v1433_v51  ;;  %v1088_v32 = vadd.f32 %v1087_v30, %v1086_v29 }
 0x2eb   :  { %958 = vst.msk [vmem:[%s1521_s6 + $0x50] sm:$0xff] %vm947_vm1, %v941_v31  ;;  %v942_v33 = vadd.f32 %v1088_v32, %v1433_v51 }
 0x2ed   :  { %959 = vst.msk [vmem:[%s1521_s6 + $0x58] sm:$0xff] %vm947_vm1, %v942_v33  ;;  %v1089_v34 = vpop.f32.mrb[56].mxu0 }
 0x2ee   :  { %v1090_v35 = vpop.f32.mrb[57].mxu0 }
 0x2ef   :  { %v1091_v36 = vadd.f32 %v1090_v35, %v1089_v34  ;;  %v1092_v37 = vpop.f32.mrb[58].mxu0 }
 0x2f0   :  { %v1093_v38 = vpop.f32.mrb[59].mxu0 }
 0x2f1   :  { %v943_v39 = vadd.f32 %v1091_v36, %v1433_v51  ;;  %v1094_v40 = vadd.f32 %v1093_v38, %v1092_v37 }
 0x2f3   :  { %960 = vst.msk [vmem:[%s1521_s6 + $0x60] sm:$0xff] %vm947_vm1, %v943_v39  ;;  %v944_v41 = vadd.f32 %v1094_v40, %v1433_v51 }
 0x2f5   :  { %961 = vst.msk [vmem:[%s1521_s6 + $0x68] sm:$0xff] %vm947_vm1, %v944_v41  ;;  %v1095_v42 = vpop.f32.mrb[60].mxu0 }
 0x2f6   :  { %v1096_v43 = vpop.f32.mrb[61].mxu0 }
 0x2f7   :  { %v1097_v44 = vadd.f32 %v1096_v43, %v1095_v42  ;;  %v1098_v45 = vpop.f32.mrb[62].mxu0 }
 0x2f8   :  { %v1099_v46 = vpop.f32.mrb[63].mxu0 }
 0x2f9   :  { %v945_v47 = vadd.f32 %v1097_v44, %v1433_v51  ;;  %v1100_v48 = vadd.f32 %v1099_v46, %v1098_v45 }
 0x2fb   :  { %962 = vst.msk [vmem:[%s1521_s6 + $0x70] sm:$0xff] %vm947_vm1, %v945_v47  ;;  %v946_v49 = vadd.f32 %v1100_v48, %v1433_v51 }
 0x2fd   :  { %963 = vst.msk [vmem:[%s1521_s6 + $0x78] sm:$0xff] %vm947_vm1, %v946_v49 }
 0x2fe   :  { %968 = vsyncpa [#allocation4], 1 }
 0x2ff   :  { %969 = vsyncpa [#allocation6], 1 }

</bundles_post_ra>
